<compile_context>
chip_gen: v7x
topology: tpu7x:2x2x1
jax: 0.10.0
libtpu: 0.0.40
codegen_flags: <defaults>
</compile_context>

<pallas_src>
import jax
import jax.numpy as jnp
from jax.experimental import pallas as pl
from jax.experimental.pallas import tpu as pltpu


def _logreg_kernel(x_ref, w_ref, b_ref, o_ref):
    # x_ref: (TB, F) f32 VMEM tile of the batch (streamed, double-buffered)
    # w_ref: (1, F)  f32 VMEM, resident across the whole grid
    # b_ref: (1,)    f32 SMEM scalar
    # o_ref: (1, 1, TB) f32 VMEM, lane-dense output row for this batch tile
    #
    # NT contraction: both operands contract their minor (lane) dimension, so
    # Mosaic feeds the MXU without transposing the big streamed x tile and the
    # result lands directly in the (1, TB) row layout.
    z = jax.lax.dot_general(
        w_ref[...], x_ref[...],
        dimension_numbers=(((1,), (1,)), ((), ())),   # w @ x^T -> (1, TB)
        preferred_element_type=jnp.float32,
    )
    z = z + b_ref[0]
    # exp() runs on the EUP; keep the divide exact on the VPU so the 1e-5
    # correctness check holds (pl.reciprocal(approx=True) is ~1e-3 error).
    o_ref[0] = (1.0 / (1.0 + jnp.exp(-z))).astype(o_ref.dtype)


def _round_up(n, m):
    return ((n + m - 1) // m) * m


def _vmem_limit_bytes():
    """Generation-aware scoped-VMEM request.

    v7x has only 64 MiB of physical VMEM per TensorCore, v5e/v6e have 128 MiB.
    Ask for ~3/4 of physical (capped) and fall back to the most constrained
    generation if the query is unavailable.
    """
    cap = 64 * 1024 * 1024  # conservative fallback: v7x per-TC physical VMEM
    try:
        info_cap = int(pltpu.get_tpu_info().vmem_capacity_bytes)
        if info_cap > 0:
            cap = info_cap
    except Exception:
        pass
    return max(16 * 1024 * 1024, min((cap * 3) // 4, 80 * 1024 * 1024))


def _choose_block_b(batch, features, itemsize, vmem_budget_bytes, hbm_tile_bytes):
    """Pick TB (batch rows per tile) by bytes, lane-padding aware."""
    f_pad = _round_up(max(features, 1), 128)

    # Rows that deliver ~hbm_tile_bytes of *real* HBM bytes of x per tile.
    tb_hbm = hbm_tile_bytes // max(1, features * itemsize)

    # VMEM footprint per batch row:
    #   x:   2 double-buffered (TB, F) blocks, F lane-padded to 128
    #   out: 2 double-buffered (1, 1, TB) f32 blocks, sublane-padded to 8
    per_row = 2 * f_pad * itemsize + 2 * 8 * 4
    fixed = 2 * 8 * f_pad * 4          # resident (1, F) w block (padded, 2 bufs)
    fixed += 4 * 1024 * 1024           # Mosaic internal scratch headroom
    tb_vmem = max(0, vmem_budget_bytes - fixed) // per_row

    tb = min(tb_hbm, tb_vmem)
    # Keep >=2 tiles for large batches (both v7x TensorCores get work) and
    # don't tile far past the batch itself.
    tb = min(tb, max(128, _round_up(pl.cdiv(max(batch, 1), 2), 128)))

    if tb >= 128:
        tb = (tb // 128) * 128         # full-lane (1, 1, TB) output stores
    else:
        # Fat-F fallback (VMEM-bound); accepts masked output stores.
        # TODO(synk): replace with a K/reduction grid axis for very large F.
        tb = max(8, (tb // 8) * 8)
    return tb


def logistic_regression(x, w, b, *, block_b=None):
    """sigmoid(x @ w.T + b).

    x: (B, F) f32;  w: (1, F) f32 (PyTorch nn.Linear layout);  b: (1,) f32.
    Returns (B, 1) f32.
    """
    x = jnp.asarray(x, jnp.float32)
    B, F = x.shape
    w = jnp.asarray(w, jnp.float32).reshape(1, F)
    b = jnp.asarray(b, jnp.float32).reshape(1)

    vmem_limit = _vmem_limit_bytes()
    if block_b is None:
        tb = _choose_block_b(B, F, x.dtype.itemsize, vmem_limit,
                             hbm_tile_bytes=8 * 1024 * 1024)
    else:
        # Round UP to 128 so the (1, 1, TB) output row stays lane-dense.
        tb = max(128, _round_up(int(block_b), 128))
    tb = max(8, tb)

    # No jnp.pad of x: the grid covers cdiv(B, tb) tiles and Pallas handles the
    # ragged last block (out-of-bounds rows read garbage -> garbage logits that
    # depend only on their own row and are sliced off below).
    num_tiles = pl.cdiv(B, tb)

    out = pl.pallas_call(
        _logreg_kernel,
        out_shape=jax.ShapeDtypeStruct((num_tiles, 1, tb), jnp.float32),
        grid=(num_tiles,),
        in_specs=[
            pl.BlockSpec((tb, F), lambda i: (i, 0)),             # x: streamed tiles
            pl.BlockSpec((1, F), lambda i: (0, 0)),              # w: resident
            pl.BlockSpec(memory_space=pltpu.MemorySpace.SMEM),   # b: SMEM scalar
        ],
        out_specs=pl.BlockSpec((1, 1, tb), lambda i: (i, 0, 0)),  # lane-dense rows
        compiler_params=pltpu.CompilerParams(
            dimension_semantics=("parallel",),
            vmem_limit_bytes=vmem_limit,
        ),
    )(x, w, b)

    # (num_tiles, 1, TB) row-major == batch order; drop ragged tail, restore (B, 1).
    return out.reshape(-1)[:B].reshape(B, 1)


if __name__ == "__main__":
    batch = 200          # not a multiple of the tile -> exercises the ragged last block
    input_size = 32      # X_train.shape[1] analogue

    key = jax.random.PRNGKey(0)
    kx, kw, kb = jax.random.split(key, 3)

    x = jax.random.normal(kx, (batch, input_size), dtype=jnp.float32)

    # nn.Linear(input_size, 1)-style init: weight (1, F), bias (1,)
    bound = 1.0 / float(input_size) ** 0.5
    w = jax.random.uniform(kw, (1, input_size), minval=-bound, maxval=bound,
                           dtype=jnp.float32)
    b = jax.random.uniform(kb, (1,), minval=-bound, maxval=bound,
                           dtype=jnp.float32)

    out = logistic_regression(x, w, b)   # auto tiling: TB=128 -> 2 tiles, ragged tail
    out = jax.block_until_ready(out)

    # Pure-JAX reference check
    ref = jax.nn.sigmoid(x @ w.T + b)
    assert out.shape == (batch, 1)
    err = float(jnp.max(jnp.abs(out - ref)))
    assert jnp.allclose(out, ref, atol=1e-5, rtol=1e-5), f"max abs err = {err}"

    print("KERNEL_OK")
</pallas_src>

<mosaic_0001>
module attributes {stable_mosaic.version = 11 : i64} {
  func.func @_logreg_kernel(%arg0: i32, %arg1: memref<128x32xf32, #tpu.memory_space<vmem>>, %arg2: memref<1x32xf32, #tpu.memory_space<vmem>>, %arg3: memref<1xf32, #tpu.memory_space<smem>>, %arg4: memref<1x1x128xf32, #tpu.memory_space<vmem>>) attributes {dimension_semantics = [#tpu.dimension_semantics<parallel>], iteration_bounds = array<i64: 2>, scalar_prefetch = 0 : i64, scratch_operands = 0 : i64, tpu.core_type = #tpu.core_type<tc>, window_params = [{transform_indices = @transform_0, window_bounds = array<i64: 128, 32>}, {pipeline_mode = #tpu.pipeline_mode<synchronous>, transform_indices = @transform_1, window_bounds = array<i64: 1, 32>}, {transform_indices = @transform_2, window_bounds = array<i64: 1>}, {transform_indices = @transform_3, window_bounds = array<i64: 1, 1, 128>}]} {
    %c0 = arith.constant 0 : index
    %c0_0 = arith.constant 0 : index
    %0 = vector.load %arg2[%c0, %c0_0] : memref<1x32xf32, #tpu.memory_space<vmem>>, vector<1x32xf32>
    %c0_1 = arith.constant 0 : index
    %c0_2 = arith.constant 0 : index
    %1 = vector.load %arg1[%c0_1, %c0_2] : memref<128x32xf32, #tpu.memory_space<vmem>>, vector<128x32xf32>
    %cst = arith.constant dense<0.000000e+00> : vector<1x128xf32>
    %2 = tpu.matmul %0, %1, %cst {dimension_numbers = #tpu.dot_dimension_numbers<[1], [1], [0], [0], [0, 0, 1, 0], [], []>} : vector<1x32xf32>, vector<128x32xf32>, vector<1x128xf32> -> vector<1x128xf32>
    %c0_3 = arith.constant 0 : index
    %3 = memref.load %arg3[%c0_3] : memref<1xf32, #tpu.memory_space<smem>>
    %4 = vector.broadcast %3 : f32 to vector<1x128xf32>
    %5 = arith.addf %2, %4 : vector<1x128xf32>
    %cst_4 = arith.constant 0.000000e+00 : f32
    %6 = vector.broadcast %cst_4 : f32 to vector<1x128xf32>
    %7 = arith.subf %6, %5 : vector<1x128xf32>
    %8 = math.exp %7 : vector<1x128xf32>
    %cst_5 = arith.constant 1.000000e+00 : f32
    %9 = vector.broadcast %cst_5 : f32 to vector<1x128xf32>
    %10 = arith.addf %9, %8 : vector<1x128xf32>
    %cst_6 = arith.constant 1.000000e+00 : f32
    %11 = vector.broadcast %cst_6 : f32 to vector<1x128xf32>
    %12 = arith.divf %11, %10 : vector<1x128xf32>
    %c0_7 = arith.constant 0 : index
    %c0_8 = arith.constant 0 : index
    %c0_9 = arith.constant 0 : index
    %13 = vector.load %arg4[%c0_7, %c0_8, %c0_9] : memref<1x1x128xf32, #tpu.memory_space<vmem>>, vector<1x1x128xf32>
    %14 = vector.shape_cast %13 : vector<1x1x128xf32> to vector<1x128xf32>
    %15 = vector.shape_cast %12 : vector<1x128xf32> to vector<1x1x128xf32>
    tpu.vector_store %arg4[%c0_7, %c0_8, %c0_9], %15 {strides = array<i32>} : memref<1x1x128xf32, #tpu.memory_space<vmem>>, vector<1x1x128xf32>,
    return
  }
  func.func @transform_0(%arg0: i32) -> (i32, i32) {
    %c0_i32 = arith.constant 0 : i32
    %c0_i32_0 = arith.constant 0 : i32
    return %arg0, %c0_i32 : i32, i32
  }
  func.func @transform_1(%arg0: i32) -> (i32, i32) {
    %c0_i32 = arith.constant 0 : i32
    %c0_i32_0 = arith.constant 0 : i32
    %c0_i32_1 = arith.constant 0 : i32
    return %c0_i32, %c0_i32_0 : i32, i32
  }
  func.func @transform_2(%arg0: i32) -> i32 {
    %c0_i32 = arith.constant 0 : i32
    %c0_i32_0 = arith.constant 0 : i32
    return %c0_i32 : i32
  }
  func.func @transform_3(%arg0: i32) -> (i32, i32, i32) {
    %c0_i32 = arith.constant 0 : i32
    %c0_i32_0 = arith.constant 0 : i32
    %c0_i32_1 = arith.constant 0 : i32
    return %arg0, %c0_i32, %c0_i32_0 : i32, i32, i32
  }
}

</mosaic_0001>

<bundles_post_ra>
// kernel: tpu_custom_call.1
= control target key start
LH: loop header
LB: loop body
LE: loop exit
PB: predicated region body
PF: predicated region fallthrough
CT: control target
= control target key end

     0   :  { %s797_s0 = inlined_call_operand.vmem [shape: f32[200,32], index: 0, kind: input, shape index: {}]   ;;  %s798_s1 = inlined_call_operand.vmem [shape: f32[1,32], index: 1, kind: input, shape index: {}]   ;;  %s799_s2 = inlined_call_operand.<no memory space> [shape: f32[1], index: 2, kind: input, shape index: {}]   ;;  %s800_s3 = inlined_call_operand.hbm [shape: f32[2,1,128], index: 3, kind: output, shape index: {}]  }
   0x1   :  { %8 = sst [smem:[#allocation2]] %s799_s2 }
   0x2   :  { %9 = vsyncpa [#allocation4], 0 }
   0x3   :  { %11 = vsyncpa [#allocation4 + $0x1], 0  ;;  %s654_s14 = smov 0   ;;  %s656_s15 = smov 0  }
   0x4   :  { %s658_s16 = smov 0   ;;  %s660_s17 = smov 0  }
   0x5 LB: > { %s406_s2 = sadd.s32 4294967295, %s625_s17   ;;  %s407_s18 = sadd.s32 4294967294, %s625_s17   ;;  %s625_s17 = sphi %s660_s17, %s808_s17   ;;  %s621_s16 = sphi %s658_s16, %s807_s16   ;;  %s617_s15 = sphi %s656_s15, %s806_s15   ;;  %s613_s14 = sphi %s654_s14, %s805_s14  }
   0x6   : > { %s677_s19 = sadd.s32 1, %s625_s17   ;;  %s92_s20 = sadd.s32 1, %s621_s16 }
   0x7   : > { %s89_s21 = ssub.s32 %s625_s17, %s677_s19  ;;  %p102_p0 = scmp.ne.s32.totalorder %s621_s16, %s617_s15 }
   0x8   : > { %p90_p1 = scmp.eq.s32.totalorder %s89_s21, 0  ;;  %p103_p2 = scmp.eq.s32.totalorder %s406_s2, 1 }
   0x9   : > { %p108_p3 = scmp.ne.s32.totalorder %s617_s15, %s613_s14  ;;  %p109_p4 = scmp.eq.s32.totalorder %s407_s18, 1 }
   0xa   : > { %s687_s22 = scalar_select %p90_p1, %s621_s16, %s92_s20  }
   0xb   : > { %p689_p5 = por %p103_p2, %p102_p0  ;;  %p693_p6 = por %p109_p4, %p108_p3 }
   0xc   : > { %p410_p7 = scmp.ge.s32.totalorder %s625_s17, 1  ;;  %p150_p8 = scmp.lt.s32.totalorder %s625_s17, 3 }
   0xe   : > { %p151_p9 = pnand %p410_p7, %p150_p8 }
   0xf   : > { %s699_s25 = sshll.u32 (!%p151_p9), %s406_s2, 4  ;;  %v627_v0 = vmov (!%p151_p9), 0.0|0.0   ;;  %vm628_vm0 = vmmov (!%p151_p9), 0   ;;  %v629_v1 = vmov (!%p151_p9), 0.0   ;;  %vm210_vm1 = vcmask (!%p151_p9), 261120   ;;  %s208_s6 = sld [smem:[#allocation2]] (!%p151_p9) }
  0x10   : > { %154 = sbr.rel (%p151_p9) target bundleno = 349 (0x15d), region = 32  ;;  %485 = vmatprep.subr.bf16.mxu0 (!%p151_p9), %v627_v0  ;;  %p182_p10 = scmp.lt.s32.totalorder (!%p151_p9), %s699_s25, 24  ;;  %482 = vmatprep.mubr.msk.f32.mxu0 (!%p151_p9), %vm628_vm0, %v629_v1  ;;  %vm712_vm2 = vmpackc.low (!%p151_p9), %vm210_vm1, %vm210_vm1  ;;  %v191_v27 = vld [vmem:[%s798_s1] sm:$0x1] (!%p151_p9) }
  0x11   : > { %s175_s7 = sand.u32 (!%p151_p9), 1, %s617_s15   ;;  %s755_s12 = scalar_lea.hbm (!%p151_p9), %s800_s3, %s699_s25 }
  0x12   : > { %s176_s8 = scalar_lea.vmem (!%p151_p9), [#allocation3], %s175_s7  ;;  %s340_s13 = scalar_lea.sflag (!%p151_p9), [#allocation4], %s175_s7 }
  0x13   : > { %s352_s9 = sshll.u32 (!%p151_p9), %s176_s8, 4  ;;  %s630_s18 = smov (!%p151_p9), [#allocation3]   ;;  %s757_s9 = int_to_ptr.vmem [resolvable:$true] %s352_s9 }
  0x14   : > { %s563_s2 = scalar_lea.vmem (!%p151_p9), %s757_s9, 16  ;;  %s567_s20 = sshll.u32 (!%p151_p9), %s630_s18, 4  ;;  %s568_s20 = int_to_ptr.vmem [resolvable:$false] %s567_s20 }
  0x15   : > { %v209_v28 = vstv (!%p151_p9), %s208_s6  ;;  %p564_p11 = scmp.ne.s32.totalorder (!%p151_p9), %s757_s9, %s563_s2  ;;  %s569_s21 = scalar_lea.vmem (!%p151_p9), %s568_s20, 32 }
  0x16   : > { %p570_p0 = scmp.lt.s32.totalorder (!%p151_p9), %s757_s9, %s568_s20  ;;  %p571_p1 = scmp.lt.s32.totalorder (!%p151_p9), %s569_s21, %s563_s2 }
  0x17   : > { %s183_s26 = scalar_select %p182_p10, %s699_s25, 24 }
  0x18   : > { %p565_p12 = pnand %p564_p11, %p689_p5  ;;  %p572_p2 = por %p571_p1, %p570_p0 }
  0x19   : > { %s412_s27 = sshll.u32 %s183_s26, 3 }
  0x1a   : > { %s706_s30 = scalar_lea.vmem %s797_s0, %s412_s27  ;;  %p566_p13 = pneg %p565_p12 }
  0x1b   : > { %v192_v2 = vld [vmem:[%s706_s30] sm:$0xff]  ;;  %v193_v3 = vld [vmem:[%s706_s30 + $0x8] sm:$0xff]  ;;  %v194_v6 = vld [vmem:[%s706_s30 + $0x10] sm:$0xff] }
  0x1c   : > { %v486_v5 = vpack.c.bf16 %v193_v3, %v192_v2  ;;  %v195_v7 = vld [vmem:[%s706_s30 + $0x18] sm:$0xff]  ;;  %v196_v9 = vld [vmem:[%s706_s30 + $0x20] sm:$0xff]  ;;  %v197_v10 = vld [vmem:[%s706_s30 + $0x28] sm:$0xff]  ;;  %p573_p3 = pnand %p572_p2, %p566_p13 }
  0x1d   : > { %v490_v8 = vpack.c.bf16 %v195_v7, %v194_v6  ;;  %v494_v11 = vpack.c.bf16 %v197_v10, %v196_v9  ;;  %v198_v12 = vld [vmem:[%s706_s30 + $0x30] sm:$0xff]  ;;  %v199_v13 = vld [vmem:[%s706_s30 + $0x38] sm:$0xff]  ;;  %v200_v15 = vld [vmem:[%s706_s30 + $0x40] sm:$0xff] }
  0x1e   : > { %488 = vmatpush3.bf16.xpose.msk.msra.mxu0 %vm712_vm2, %v486_v5  ;;  %v498_v14 = vpack.c.bf16 %v199_v13, %v198_v12  ;;  %v201_v16 = vld [vmem:[%s706_s30 + $0x48] sm:$0xff]  ;;  %v202_v18 = vld [vmem:[%s706_s30 + $0x50] sm:$0xff]  ;;  %v203_v19 = vld [vmem:[%s706_s30 + $0x58] sm:$0xff] }
  0x1f   : > { %489 = vmatprep.subr.bf16.mxu0 %v627_v0  ;;  %v502_v17 = vpack.c.bf16 %v201_v16, %v200_v15  ;;  %v506_v20 = vpack.c.bf16 %v203_v19, %v202_v18  ;;  %v204_v21 = vld [vmem:[%s706_s30 + $0x60] sm:$0xff]  ;;  %v205_v22 = vld [vmem:[%s706_s30 + $0x68] sm:$0xff]  ;;  %v206_v24 = vld [vmem:[%s706_s30 + $0x70] sm:$0xff] }
  0x20   : > { %v510_v23 = vpack.c.bf16 %v205_v22, %v204_v21  ;;  %v207_v25 = vld [vmem:[%s706_s30 + $0x78] sm:$0xff] }
  0x21   : > { %v514_v26 = vpack.c.bf16 %v207_v25, %v206_v24 }
  0x26   : > { %492 = vmatpush3.bf16.xpose.msk.msra.mxu0 %vm712_vm2, %v490_v8 }
  0x27   : > { %493 = vmatprep.subr.bf16.mxu0 %v627_v0 }
  0x2e   : > { %496 = vmatpush3.bf16.xpose.msk.msra.mxu0 %vm712_vm2, %v494_v11 }
  0x2f   : > { %497 = vmatprep.subr.bf16.mxu0 %v627_v0 }
  0x36   : > { %500 = vmatpush3.bf16.xpose.msk.msra.mxu0 %vm712_vm2, %v498_v14 }
  0x37   : > { %501 = vmatprep.subr.bf16.mxu0 %v627_v0 }
  0x3e   : > { %504 = vmatpush3.bf16.xpose.msk.msra.mxu0 %vm712_vm2, %v502_v17 }
  0x3f   : > { %505 = vmatprep.subr.bf16.mxu0 %v627_v0 }
  0x46   : > { %508 = vmatpush3.bf16.xpose.msk.msra.mxu0 %vm712_vm2, %v506_v20 }
  0x47   : > { %509 = vmatprep.subr.bf16.mxu0 %v627_v0 }
  0x4e   : > { %512 = vmatpush3.bf16.xpose.msk.msra.mxu0 %vm712_vm2, %v510_v23 }
  0x4f   : > { %513 = vmatprep.subr.bf16.mxu0 %v627_v0 }
  0x56   : > { %516 = vmatpush3.bf16.xpose.msk.msra.mxu0 %vm712_vm2, %v514_v26 }
  0x5d   : > { %483 = vmatmul.mubr.msk.f32.vlgmr.msra.gmra.mrb[0].mxu0 %vm210_vm1, %v191_v27 }
 0x130   : > { %v328_v29 = vpop.f32.mrb[0].mxu0 }
 0x131   : > { %v329_v30 = vadd.f32 %v328_v29, %v209_v28  ;;  %v484_v31 = vpop.f32.mrb[1].mxu0 }
 0x133   : > { %v332_v32 = vsub.f32 0.0, %v329_v30 }
 0x135   : > { %v333_v33 = vmul.f32 1.442695, %v332_v32 }
 0x137   : > { %559 = vpow2.f32 %v333_v33 }
 0x141   : > { %v560_v34 = vpop.eup %559 }
 0x142   : > { %v335_v35 = vadd.f32 1.0, %v560_v34 }
 0x144   : > { %561 = vrcp.f32 %v335_v35 }
 0x14e   : > { %v562_v36 = vpop.eup %561 }
 0x14f   : > { %338 = vst [vmem:[%s176_s8] sm:$0x1] %v562_v36 }
 0x150   : > { %576 = shalt.err (!%p573_p3)
}
 0x151   : > { %s577_s25 = scalar_lea.hbm %s755_s12, 16  ;;  %s581_s28 = scalar_lea.hbm %s800_s3, 32 }
 0x152   : > { %p578_p4 = scmp.ne.s32.totalorder %s755_s12, %s577_s25  ;;  %p582_p9 = scmp.lt.u32.totalorder %s755_s12, %s800_s3 }
 0x153   : > { %p583_p10 = scmp.lt.u32.totalorder %s581_s28, %s577_s25  ;;  %p585_p12 = scmp.lt.u32.totalorder %s577_s25, %s755_s12 }
 0x154   : > { %p579_p7 = pnand %p578_p4, %p689_p5 }
 0x155   : > { %p584_p11 = por %p583_p10, %p582_p9 }
 0x156   : > { %p580_p8 = pneg %p579_p7 }
 0x157   : > { %p586_p13 = por %p585_p12, %p584_p11 }
 0x159   : > { %p587_p0 = pnand %p586_p13, %p580_p8 }
 0x15b   : > { %590 = shalt.err (!%p587_p0)
}
 0x15c   : > { %517 = dma.vmem_to_hbm [thread:$0]  (%p689_p5), %s757_s9, 16, %s755_s12, %s340_s13  }
 0x15d PF: > { %p523_p1 = scmp.ge.s32.totalorder %s625_s17, 2  ;;  %s364_s4 = sand.u32 1, %s613_s14  }
 0x15e   : > { %s365_s5 = scalar_lea.sflag [#allocation4], %s364_s4 }
 0x15f   : > { %p520_p2 = pnand %p523_p1, %p693_p6 }
 0x161   : > { %608 = dma.done.wait (!%p520_p2), %s365_s5, 16  }
 0x162   : > { %610 = vsyncadd (!%p520_p2), %s365_s5, 4294967280  ;;  %p14_p3 = scmp.ge.s32.totalorder %s677_s19, 4   ;;  %s805_s14 = smov %s617_s15 }
 0x163   : > { %s806_s15 = smov %s621_s16  ;;  %s807_s16 = smov %s687_s22 }
 0x164   : > { %s808_s17 = smov %s677_s19  ;;  %16 = sbr.rel (!%p14_p3) target bundleno = 5 (0x5), region = 67 }
 0x16b   :  { %369 = vsyncpa [#allocation4], 1 }
 0x16c   :  { %371 = vsyncpa [#allocation4 + $0x1], 1 }

</bundles_post_ra>
